<compile_context>
chip_gen: v7x
topology: tpu7x:2x2x1
jax: 0.10.0
libtpu: 0.0.40
codegen_flags: <defaults>
</compile_context>

<pallas_src>
import functools

import jax
import jax.numpy as jnp
from jax.experimental import pallas as pl
from jax.experimental.pallas import tpu as pltpu


def _softmax_global_sum_kernel(x_ref, out_ref, *, rows, tile_rows):
    """Softmax over the last dim of the (tile_rows, D) block; accumulate the
    sum of all probabilities into the resident (1, 1) f32 accumulator."""
    i = pl.program_id(0)

    @pl.when(i == 0)
    def _init():
        out_ref[...] = jnp.zeros_like(out_ref)

    x = x_ref[...].astype(jnp.float32)

    # Static (shapes are static): only mask when the grid has a partial tail block.
    needs_mask = (rows % tile_rows) != 0
    if needs_mask:
        ridx = i * tile_rows + jax.lax.broadcasted_iota(jnp.int32, (tile_rows, 1), 0)
        valid = ridx < rows
        x = jnp.where(valid, x, 0.0)          # neutralize padded / OOB rows

    m = jnp.max(x, axis=-1, keepdims=True)
    e = jnp.exp(x - m)
    p = e / jnp.sum(e, axis=-1, keepdims=True)

    if needs_mask:
        p = jnp.where(valid, p, 0.0)          # drop padded-row probabilities

    out_ref[...] += jnp.sum(p, keepdims=True)  # (1, 1) partial -> accumulator


def _softmax_global_sum(logits_2d):
    """Scalar sum(softmax(logits_2d, axis=-1)) in one fused Pallas pass."""
    rows, d = logits_2d.shape
    if rows == 0 or d == 0:                    # empty input: contributes nothing
        return jnp.float32(0.0)

    # dtype-aware packed sublane multiple (8 f32 / 16 bf16 / 32 int8).
    itemsize = jnp.dtype(logits_2d.dtype).itemsize
    sublane = 8 * max(1, 4 // itemsize)

    # Large row tiles (softmax dim D stays whole on the lane axis). Cap each
    # block at ~2 MiB so the double-buffered input stays well under every
    # generation's scoped-VMEM default (16 MiB v5e, 32 MiB v6e/v7x, 64 MiB
    # physical on v7x) — no vmem_limit override needed.
    bytes_per_row = max(1, d * itemsize)
    cap_rows = max(sublane, (2 * 1024 * 1024) // bytes_per_row)
    tile_rows = min(rows, 1024, cap_rows)
    tile_rows = max(sublane, ((tile_rows + sublane - 1) // sublane) * sublane)

    grid = (int(pl.cdiv(rows, tile_rows)),)    # partial tail handled by in-kernel mask

    kernel = functools.partial(
        _softmax_global_sum_kernel, rows=rows, tile_rows=tile_rows)

    out = pl.pallas_call(
        kernel,
        out_shape=jax.ShapeDtypeStruct((1, 1), jnp.float32),
        grid_spec=pltpu.PrefetchScalarGridSpec(
            num_scalar_prefetch=0,
            grid=grid,
            in_specs=[pl.BlockSpec((tile_rows, d), lambda i: (i, 0))],
            out_specs=pl.BlockSpec((1, 1), lambda i: (0, 0)),
        ),
        compiler_params=pltpu.CompilerParams(
            # Single resident accumulator across the grid -> reduction axis
            # must be "arbitrary".
            dimension_semantics=("arbitrary",),
        ),
    )(logits_2d)
    return out[0, 0]


def tta_forward(x, transforms, model_fn):
    """mean over all elements of softmax(model(t(x)), axis=-1) for t in transforms."""
    total = jnp.float32(0.0)
    count = 0
    for transform in transforms:
        logits = model_fn(transform(x))
        logits_2d = logits.reshape(-1, logits.shape[-1])   # metadata-only reshape
        total = total + _softmax_global_sum(logits_2d)
        count += logits.size
    return total / jnp.float32(count)


if __name__ == "__main__":
    key = jax.random.PRNGKey(0)
    x = jax.random.normal(key, (2, 4, 16, 16), dtype=jnp.float32)

    # TODO(synk): the wrapped `model` is an arbitrary user nn.Module with no
    # Pallas equivalent; an identity model stands in for it here.
    model_fn = lambda a: a
    transforms = (
        lambda a: a,                     # identity
        lambda a: jnp.flip(a, axis=-1),  # horizontal flip
        lambda a: jnp.flip(a, axis=-2),  # vertical flip
    )

    y = tta_forward(x, transforms, model_fn)
    jax.block_until_ready(y)

    # Pure-JAX reference of the TTA forward.
    ref = jnp.mean(
        jnp.stack([jax.nn.softmax(model_fn(t(x)).astype(jnp.float32), axis=-1)
                   for t in transforms]))

    assert y.shape == (), y.shape
    assert bool(jnp.allclose(y, ref, rtol=1e-5, atol=1e-6)), (float(y), float(ref))
    print("KERNEL_OK")
</pallas_src>

<mosaic_0001>
module attributes {stable_mosaic.version = 11 : i64} {
  func.func @_softmax_global_sum_kernel(%arg0: i32, %arg1: memref<128x16xf32, #tpu.memory_space<vmem>>, %arg2: memref<1x1xf32, #tpu.memory_space<vmem>>) attributes {dimension_semantics = [#tpu.dimension_semantics<arbitrary>], iteration_bounds = array<i64: 1>, scalar_prefetch = 0 : i64, scratch_operands = 0 : i64, tpu.core_type = #tpu.core_type<tc>, window_params = [{transform_indices = @transform_0, window_bounds = array<i64: 128, 16>}, {pipeline_mode = #tpu.pipeline_mode<synchronous>, transform_indices = @transform_1, window_bounds = array<i64: 1, 1>}]} {
    %c0_i32 = arith.constant 0 : i32
    %0 = arith.cmpi eq, %arg0, %c0_i32 : i32
    %1 = arith.extui %0 : i1 to i32
    %c0_i32_0 = arith.constant 0 : i32
    %2 = arith.cmpi ne, %1, %c0_i32_0 : i32
    scf.if %2 {
      %cst_8 = arith.constant 0.000000e+00 : f32
      %21 = vector.broadcast %cst_8 : f32 to vector<1x1xf32>
      %c0_9 = arith.constant 0 : index
      %c0_10 = arith.constant 0 : index
      %22 = vector.load %arg2[%c0_9, %c0_10] : memref<1x1xf32, #tpu.memory_space<vmem>>, vector<1x1xf32>
      tpu.vector_store %arg2[%c0_9, %c0_10], %21 {strides = array<i32>} : memref<1x1xf32, #tpu.memory_space<vmem>>, vector<1x1xf32>,
    } else {
    }
    %c0 = arith.constant 0 : index
    %c0_1 = arith.constant 0 : index
    %3 = vector.load %arg1[%c0, %c0_1] : memref<128x16xf32, #tpu.memory_space<vmem>>, vector<128x16xf32>
    %cst = arith.constant dense<0xFF800000> : vector<128xf32>
    %4 = vector.multi_reduction <maximumf>, %3, %cst [1] : vector<128x16xf32> to vector<128xf32>
    %5 = vector.shape_cast %4 : vector<128xf32> to vector<128x1xf32>
    %6 = vector.broadcast %5 : vector<128x1xf32> to vector<128x16xf32>
    %7 = arith.subf %3, %6 : vector<128x16xf32>
    %8 = math.exp %7 : vector<128x16xf32>
    %cst_2 = arith.constant dense<0.000000e+00> : vector<128xf32>
    %9 = vector.multi_reduction <add>, %8, %cst_2 [1] : vector<128x16xf32> to vector<128xf32>
    %10 = vector.shape_cast %9 : vector<128xf32> to vector<128x1xf32>
    %11 = vector.broadcast %10 : vector<128x1xf32> to vector<128x16xf32>
    %12 = arith.divf %8, %11 : vector<128x16xf32>
    %c0_3 = arith.constant 0 : index
    %c0_4 = arith.constant 0 : index
    %13 = vector.load %arg2[%c0_3, %c0_4] : memref<1x1xf32, #tpu.memory_space<vmem>>, vector<1x1xf32>
    %14 = vector.shape_cast %12 : vector<128x16xf32> to vector<1x128x16xf32>
    %cst_5 = arith.constant dense<0.000000e+00> : vector<1xf32>
    %15 = vector.multi_reduction <add>, %14, %cst_5 [1, 2] : vector<1x128x16xf32> to vector<1xf32>
    %16 = vector.shape_cast %15 : vector<1xf32> to vector<1x1x1xf32>
    %17 = vector.extract %16[0, 0, 0] : f32 from vector<1x1x1xf32>
    %18 = vector.broadcast %17 : f32 to vector<1x1xf32>
    %19 = arith.addf %13, %18 : vector<1x1xf32>
    %c0_6 = arith.constant 0 : index
    %c0_7 = arith.constant 0 : index
    %20 = vector.load %arg2[%c0_6, %c0_7] : memref<1x1xf32, #tpu.memory_space<vmem>>, vector<1x1xf32>
    tpu.vector_store %arg2[%c0_6, %c0_7], %19 {strides = array<i32>} : memref<1x1xf32, #tpu.memory_space<vmem>>, vector<1x1xf32>,
    return
  }
  func.func @transform_0(%arg0: i32) -> (i32, i32) {
    %c0_i32 = arith.constant 0 : i32
    %c0_i32_0 = arith.constant 0 : i32
    return %arg0, %c0_i32 : i32, i32
  }
  func.func @transform_1(%arg0: i32) -> (i32, i32) {
    %c0_i32 = arith.constant 0 : i32
    %c0_i32_0 = arith.constant 0 : i32
    %c0_i32_1 = arith.constant 0 : i32
    return %c0_i32, %c0_i32_0 : i32, i32
  }
}

</mosaic_0001>

<bundles_post_ra>
// kernel: tpu_custom_call.1
= control target key start
LH: loop header
LB: loop body
LE: loop exit
PB: predicated region body
PF: predicated region fallthrough
CT: control target
= control target key end

     0   :  { %vm31_vm0 = vcmask 130048   ;;  %s577_s0 = inlined_call_operand.vmem [shape: f32[128,16], index: 0, kind: input, shape index: {}]   ;;  %s578_s1 = inlined_call_operand.hbm [shape: f32[1,1], index: 1, kind: output, shape index: {}]  }
   0x1   :  { %v15_v0 = vld [vmem:[%s577_s0] sm:$0xff]  ;;  %v17_v1 = vld [vmem:[%s577_s0 + $0x10] sm:$0xff]  ;;  %v16_v2 = vld [vmem:[%s577_s0 + $0x8] sm:$0xff] }
   0x2   :  { %v32_v3 = vsel %vm31_vm0, %v15_v0, -inf  ;;  %v38_v4 = vsel %vm31_vm0, %v17_v1, -inf  ;;  %v18_v5 = vld [vmem:[%s577_s0 + $0x18] sm:$0xff]  ;;  %v35_v6 = vsel %vm31_vm0, %v16_v2, -inf  ;;  %v19_v8 = vld [vmem:[%s577_s0 + $0x20] sm:$0xff]  ;;  %v20_v9 = vld [vmem:[%s577_s0 + $0x28] sm:$0xff] }
   0x3   :  { %33 = vmax.xlane.f32.xlu0 %v32_v3  ;;  %39 = vmax.xlane.f32.xlu1 %v38_v4  ;;  %v41_v7 = vsel %vm31_vm0, %v18_v5, -inf }
   0x4   :  { %6 = vsyncpa [#allocation3], 0  ;;  %v44_v10 = vsel %vm31_vm0, %v19_v8, -inf  ;;  %v47_v11 = vsel %vm31_vm0, %v20_v9, -inf  ;;  %v21_v12 = vld [vmem:[%s577_s0 + $0x30] sm:$0xff]  ;;  %v22_v13 = vld [vmem:[%s577_s0 + $0x38] sm:$0xff] }
   0x5   :  { %v50_v14 = vsel %vm31_vm0, %v21_v12, -inf  ;;  %v53_v15 = vsel %vm31_vm0, %v22_v13, -inf  ;;  %v406_v16 = vld [vmem:[%s577_s0 + $0x40] sm:$0xff]  ;;  %v411_v17 = vld [vmem:[%s577_s0 + $0x48] sm:$0xff]  ;;  %v420_v20 = vld [vmem:[%s577_s0 + $0x50] sm:$0xff]  ;;  %vm13_vm1 = vcmask 0  }
   0x6   :  { %v56_v18 = vsel %vm31_vm0, %v406_v16, -inf  ;;  %v59_v19 = vsel %vm31_vm0, %v411_v17, -inf  ;;  %v425_v21 = vld [vmem:[%s577_s0 + $0x58] sm:$0xff]  ;;  %v62_v22 = vsel %vm31_vm0, %v420_v20, -inf  ;;  %v434_v24 = vld [vmem:[%s577_s0 + $0x60] sm:$0xff]  ;;  %v439_v25 = vld [vmem:[%s577_s0 + $0x68] sm:$0xff] }
   0x7   :  { %36 = vmax.xlane.f32.xlu0 %v35_v6  ;;  %42 = vmax.xlane.f32.xlu1 %v41_v7  ;;  %v65_v23 = vsel %vm31_vm0, %v425_v21, -inf  ;;  %v68_v26 = vsel %vm31_vm0, %v434_v24, -inf  ;;  %v71_v27 = vsel %vm31_vm0, %v439_v25, -inf  ;;  %v448_v28 = vld [vmem:[%s577_s0 + $0x70] sm:$0xff]  ;;  %v453_v29 = vld [vmem:[%s577_s0 + $0x78] sm:$0xff]  ;;  %s360_s0 = smov [#allocation2]  }
   0x8   :  { %v74_v30 = vsel %vm31_vm0, %v448_v28, -inf  ;;  %v77_v31 = vsel %vm31_vm0, %v453_v29, -inf  ;;  %s259_s9 = sshll.u32 %s360_s0, 4  ;;  %s260_s9 = int_to_ptr.vmem [resolvable:$true] %s259_s9 }
   0x9   :  { %s335_s11 = scalar_lea.vmem %s260_s9, 16  ;;  %s339_s12 = scalar_lea.vmem %s260_s9, 32 }
   0xa   :  { %p336_p0 = scmp.ne.s32.totalorder %s260_s9, %s335_s11  ;;  %p340_p1 = scmp.lt.s32.totalorder %s260_s9, %s260_s9 }
   0xb   :  { %45 = vmax.xlane.f32.xlu0 %v44_v10  ;;  %48 = vmax.xlane.f32.xlu1 %v47_v11  ;;  %p341_p2 = scmp.lt.s32.totalorder %s339_s12, %s335_s11 }
   0xd   :  { %p342_p3 = por %p341_p2, %p340_p1 }
   0xf   :  { %51 = vmax.xlane.f32.xlu0 %v50_v14  ;;  %54 = vmax.xlane.f32.xlu1 %v53_v15  ;;  %p343_p4 = pnand %p342_p3, %p336_p0 }
  0x13   :  { %57 = vmax.xlane.f32.xlu0 %v56_v18  ;;  %60 = vmax.xlane.f32.xlu1 %v59_v19 }
  0x17   :  { %63 = vmax.xlane.f32.xlu0 %v62_v22  ;;  %66 = vmax.xlane.f32.xlu1 %v65_v23 }
  0x1b   :  { %69 = vmax.xlane.f32.xlu0 %v68_v26  ;;  %72 = vmax.xlane.f32.xlu1 %v71_v27 }
  0x1f   :  { %75 = vmax.xlane.f32.xlu0 %v74_v30  ;;  %78 = vmax.xlane.f32.xlu1 %v77_v31 }
  0x90   :  { %v34_v32 = vpop.xlane.xlu0 %33  ;;  %v40_v33 = vpop.xlane.xlu1 %39 }
  0x91   :  { %v80_v34 = vsub.f32 %v15_v0, %v34_v32  ;;  %v82_v35 = vsub.f32 %v17_v1, %v40_v33 }
  0x93   :  { %v96_v36 = vmul.f32 1.442695, %v80_v34  ;;  %v100_v37 = vmul.f32 1.442695, %v82_v35 }
  0x94   :  { %v37_v38 = vpop.xlane.xlu0 %36  ;;  %v43_v39 = vpop.xlane.xlu1 %42 }
  0x95   :  { %271 = vpow2.f32 %v96_v36  ;;  %v81_v40 = vsub.f32 %v16_v2, %v37_v38  ;;  %v83_v41 = vsub.f32 %v18_v5, %v43_v39 }
  0x96   :  { %273 = vpow2.f32 %v100_v37 }
  0x97   :  { %v98_v42 = vmul.f32 1.442695, %v81_v40  ;;  %v102_v43 = vmul.f32 1.442695, %v83_v41 }
  0x98   :  { %v46_v44 = vpop.xlane.xlu0 %45  ;;  %v49_v45 = vpop.xlane.xlu1 %48 }
  0x99   :  { %275 = vpow2.f32 %v98_v42  ;;  %v84_v46 = vsub.f32 %v19_v8, %v46_v44  ;;  %v85_v47 = vsub.f32 %v20_v9, %v49_v45 }
  0x9a   :  { %277 = vpow2.f32 %v102_v43 }
  0x9b   :  { %v104_v48 = vmul.f32 1.442695, %v84_v46  ;;  %v106_v49 = vmul.f32 1.442695, %v85_v47 }
  0x9c   :  { %v52_v50 = vpop.xlane.xlu0 %51  ;;  %v55_v51 = vpop.xlane.xlu1 %54 }
  0x9d   :  { %279 = vpow2.f32 %v104_v48  ;;  %v86_v52 = vsub.f32 %v21_v12, %v52_v50  ;;  %v87_v53 = vsub.f32 %v22_v13, %v55_v51 }
  0x9e   :  { %281 = vpow2.f32 %v106_v49 }
  0x9f   :  { %v459_v54 = vpop.eup %271  ;;  %v108_v55 = vmul.f32 1.442695, %v86_v52  ;;  %v110_v56 = vmul.f32 1.442695, %v87_v53 }
  0xa0   :  { %v461_v57 = vpop.eup %273  ;;  %v58_v58 = vpop.xlane.xlu0 %57  ;;  %v128_v59 = vsel %vm31_vm0, %v459_v54, 0.0 }
  0xa1   :  { %v61_v60 = vpop.xlane.xlu1 %60  ;;  %283 = vpow2.f32 %v108_v55  ;;  %v88_v61 = vsub.f32 %v406_v16, %v58_v58  ;;  %129 = vadd.xlane.f32.xlu0 %v128_v59  ;;  %v134_v63 = vsel %vm31_vm0, %v461_v57, 0.0 }
  0xa2   :  { %v89_v62 = vsub.f32 %v411_v17, %v61_v60  ;;  %285 = vpow2.f32 %v110_v56 }
  0xa3   :  { %v469_v0 = vpop.eup %275  ;;  %v112_v1 = vmul.f32 1.442695, %v88_v61 }
  0xa4   :  { %v114_v2 = vmul.f32 1.442695, %v89_v62  ;;  %v471_v3 = vpop.eup %277  ;;  %v64_v4 = vpop.xlane.xlu0 %63  ;;  %v131_v5 = vsel %vm31_vm0, %v469_v0, 0.0 }
  0xa5   :  { %v67_v6 = vpop.xlane.xlu1 %66  ;;  %287 = vpow2.f32 %v112_v1  ;;  %v90_v7 = vsub.f32 %v420_v20, %v64_v4  ;;  %135 = vadd.xlane.f32.xlu0 %v134_v63  ;;  %132 = vadd.xlane.f32.xlu1 %v131_v5  ;;  %v137_v9 = vsel %vm31_vm0, %v471_v3, 0.0 }
  0xa6   :  { %v91_v8 = vsub.f32 %v425_v21, %v67_v6  ;;  %289 = vpow2.f32 %v114_v2 }
  0xa7   :  { %v479_v10 = vpop.eup %279  ;;  %v116_v11 = vmul.f32 1.442695, %v90_v7 }
  0xa8   :  { %v118_v12 = vmul.f32 1.442695, %v91_v8  ;;  %v481_v13 = vpop.eup %281  ;;  %v70_v14 = vpop.xlane.xlu0 %69  ;;  %v140_v15 = vsel %vm31_vm0, %v479_v10, 0.0 }
  0xa9   :  { %v73_v16 = vpop.xlane.xlu1 %72  ;;  %291 = vpow2.f32 %v116_v11  ;;  %v92_v17 = vsub.f32 %v434_v24, %v70_v14  ;;  %138 = vadd.xlane.f32.xlu1 %v137_v9  ;;  %141 = vadd.xlane.f32.xlu0 %v140_v15  ;;  %v143_v19 = vsel %vm31_vm0, %v481_v13, 0.0 }
  0xaa   :  { %v93_v18 = vsub.f32 %v439_v25, %v73_v16  ;;  %293 = vpow2.f32 %v118_v12 }
  0xab   :  { %v489_v20 = vpop.eup %283  ;;  %v120_v21 = vmul.f32 1.442695, %v92_v17 }
  0xac   :  { %v122_v22 = vmul.f32 1.442695, %v93_v18  ;;  %v491_v23 = vpop.eup %285  ;;  %v76_v26 = vpop.xlane.xlu0 %75  ;;  %v146_v27 = vsel %vm31_vm0, %v489_v20, 0.0 }
  0xad   :  { %v79_v30 = vpop.xlane.xlu1 %78  ;;  %295 = vpow2.f32 %v120_v21  ;;  %v94_v24 = vsub.f32 %v448_v28, %v76_v26  ;;  %144 = vadd.xlane.f32.xlu1 %v143_v19  ;;  %147 = vadd.xlane.f32.xlu0 %v146_v27  ;;  %v149_v31 = vsel %vm31_vm0, %v491_v23, 0.0 }
  0xae   :  { %v95_v25 = vsub.f32 %v453_v29, %v79_v30  ;;  %297 = vpow2.f32 %v122_v22 }
  0xaf   :  { %v499_v32 = vpop.eup %287  ;;  %v124_v33 = vmul.f32 1.442695, %v94_v24 }
  0xb0   :  { %v126_v34 = vmul.f32 1.442695, %v95_v25  ;;  %v501_v35 = vpop.eup %289  ;;  %v152_v36 = vsel %vm31_vm0, %v499_v32, 0.0 }
  0xb1   :  { %299 = vpow2.f32 %v124_v33  ;;  %150 = vadd.xlane.f32.xlu1 %v149_v31  ;;  %153 = vadd.xlane.f32.xlu0 %v152_v36  ;;  %v155_v28 = vsel %vm31_vm0, %v501_v35, 0.0 }
  0xb2   :  { %301 = vpow2.f32 %v126_v34 }
  0xb3   :  { %v507_v29 = vpop.eup %291 }
  0xb4   :  { %v509_v37 = vpop.eup %293  ;;  %v158_v38 = vsel %vm31_vm0, %v507_v29, 0.0 }
  0xb5   :  { %156 = vadd.xlane.f32.xlu1 %v155_v28  ;;  %159 = vadd.xlane.f32.xlu0 %v158_v38  ;;  %v161_v39 = vsel %vm31_vm0, %v509_v37, 0.0 }
  0xb7   :  { %v515_v40 = vpop.eup %295 }
  0xb8   :  { %v517_v41 = vpop.eup %297  ;;  %v164_v42 = vsel %vm31_vm0, %v515_v40, 0.0 }
  0xb9   :  { %162 = vadd.xlane.f32.xlu1 %v161_v39  ;;  %165 = vadd.xlane.f32.xlu0 %v164_v42  ;;  %v167_v43 = vsel %vm31_vm0, %v517_v41, 0.0 }
  0xbb   :  { %v523_v44 = vpop.eup %299 }
  0xbc   :  { %v525_v45 = vpop.eup %301  ;;  %v170_v46 = vsel %vm31_vm0, %v523_v44, 0.0 }
  0xbd   :  { %168 = vadd.xlane.f32.xlu1 %v167_v43  ;;  %171 = vadd.xlane.f32.xlu0 %v170_v46  ;;  %v173_v47 = vsel %vm31_vm0, %v525_v45, 0.0 }
  0xc1   :  { %174 = vadd.xlane.f32.xlu1 %v173_v47 }
 0x12e   :  { %v130_v48 = vpop.xlane.xlu0 %129 }
 0x12f   :  { %303 = vrcp.f32 %v130_v48 }
 0x132   :  { %v133_v49 = vpop.xlane.xlu1 %132  ;;  %v136_v50 = vpop.xlane.xlu0 %135 }
 0x133   :  { %305 = vrcp.f32 %v133_v49 }
 0x134   :  { %307 = vrcp.f32 %v136_v50 }
 0x136   :  { %v139_v51 = vpop.xlane.xlu1 %138  ;;  %v142_v52 = vpop.xlane.xlu0 %141 }
 0x137   :  { %309 = vrcp.f32 %v139_v51 }
 0x138   :  { %311 = vrcp.f32 %v142_v52 }
 0x139   :  { %v304_v53 = vpop.eup %303 }
 0x13a   :  { %v145_v55 = vpop.xlane.xlu1 %144  ;;  %v148_v56 = vpop.xlane.xlu0 %147  ;;  %v177_v58 = vmul.f32 %v304_v53, %v459_v54 }
 0x13b   :  { %313 = vrcp.f32 %v145_v55 }
 0x13c   :  { %315 = vrcp.f32 %v148_v56  ;;  %v209_v2 = vsel %vm31_vm0, %v177_v58, 0.0 }
 0x13d   :  { %v306_v59 = vpop.eup %305 }
 0x13e   :  { %v308_v60 = vpop.eup %307  ;;  %v179_v61 = vmul.f32 %v306_v59, %v469_v0  ;;  %v151_v62 = vpop.xlane.xlu1 %150 }
 0x13f   :  { %v154_v63 = vpop.xlane.xlu0 %153  ;;  %v181_v1 = vmul.f32 %v308_v60, %v461_v57  ;;  %317 = vrcp.f32 %v151_v62 }
 0x140   :  { %v210_v4 = vsel %vm31_vm0, %v179_v61, 0.0  ;;  %319 = vrcp.f32 %v154_v63 }
 0x141   :  { %v310_v5 = vpop.eup %309  ;;  %v211_v6 = vadd.f32 %v210_v4, %v209_v2  ;;  %v212_v54 = vsel %vm31_vm0, %v181_v1, 0.0 }
 0x142   :  { %v312_v7 = vpop.eup %311  ;;  %v183_v8 = vmul.f32 %v310_v5, %v471_v3  ;;  %v157_v9 = vpop.xlane.xlu1 %156 }
 0x143   :  { %v160_v11 = vpop.xlane.xlu0 %159  ;;  %v213_v0 = vadd.f32 %v212_v54, %v211_v6  ;;  %v185_v12 = vmul.f32 %v312_v7, %v479_v10  ;;  %321 = vrcp.f32 %v157_v9 }
 0x144   :  { %v214_v57 = vsel %vm31_vm0, %v183_v8, 0.0  ;;  %323 = vrcp.f32 %v160_v11 }
 0x145   :  { %v314_v14 = vpop.eup %313  ;;  %v215_v15 = vadd.f32 %v214_v57, %v213_v0  ;;  %v216_v17 = vsel %vm31_vm0, %v185_v12, 0.0 }
 0x146   :  { %v316_v16 = vpop.eup %315  ;;  %v187_v18 = vmul.f32 %v314_v14, %v481_v13  ;;  %v163_v19 = vpop.xlane.xlu1 %162 }
 0x147   :  { %v166_v21 = vpop.xlane.xlu0 %165  ;;  %v217_v22 = vadd.f32 %v216_v17, %v215_v15  ;;  %v189_v3 = vmul.f32 %v316_v16, %v489_v20  ;;  %325 = vrcp.f32 %v163_v19 }
 0x148   :  { %v218_v26 = vsel %vm31_vm0, %v187_v18, 0.0  ;;  %327 = vrcp.f32 %v166_v21 }
 0x149   :  { %v318_v10 = vpop.eup %317  ;;  %v219_v27 = vadd.f32 %v218_v26, %v217_v22  ;;  %v220_v24 = vsel %vm31_vm0, %v189_v3, 0.0 }
 0x14a   :  { %v320_v30 = vpop.eup %319  ;;  %v191_v25 = vmul.f32 %v318_v10, %v491_v23  ;;  %v169_v31 = vpop.xlane.xlu1 %168 }
 0x14b   :  { %v172_v33 = vpop.xlane.xlu0 %171  ;;  %v221_v34 = vadd.f32 %v220_v24, %v219_v27  ;;  %v193_v13 = vmul.f32 %v320_v30, %v499_v32  ;;  %329 = vrcp.f32 %v169_v31 }
 0x14c   :  { %v222_v36 = vsel %vm31_vm0, %v191_v25, 0.0  ;;  %331 = vrcp.f32 %v172_v33 }
 0x14d   :  { %v322_v20 = vpop.eup %321  ;;  %v223_v28 = vadd.f32 %v222_v36, %v221_v34  ;;  %v224_v39 = vsel %vm31_vm0, %v193_v13, 0.0 }
 0x14e   :  { %v324_v38 = vpop.eup %323  ;;  %v195_v42 = vmul.f32 %v322_v20, %v501_v35  ;;  %v175_v43 = vpop.xlane.xlu1 %174 }
 0x14f   :  { %v225_v46 = vadd.f32 %v224_v39, %v223_v28  ;;  %v197_v23 = vmul.f32 %v324_v38, %v507_v29  ;;  %333 = vrcp.f32 %v175_v43 }
 0x150   :  { %v226_v47 = vsel %vm31_vm0, %v195_v42, 0.0 }
 0x151   :  { %v326_v48 = vpop.eup %325  ;;  %v227_v32 = vadd.f32 %v226_v47, %v225_v46  ;;  %v228_v51 = vsel %vm31_vm0, %v197_v23, 0.0 }
 0x152   :  { %v328_v49 = vpop.eup %327  ;;  %v199_v50 = vmul.f32 %v326_v48, %v509_v37 }
 0x153   :  { %v201_v52 = vmul.f32 %v328_v49, %v515_v40  ;;  %v229_v53 = vadd.f32 %v228_v51, %v227_v32 }
 0x154   :  { %v230_v55 = vsel %vm31_vm0, %v199_v50, 0.0 }
 0x155   :  { %v330_v35 = vpop.eup %329  ;;  %v231_v56 = vadd.f32 %v230_v55, %v229_v53  ;;  %v232_v59 = vsel %vm31_vm0, %v201_v52, 0.0 }
 0x156   :  { %v332_v58 = vpop.eup %331  ;;  %v203_v29 = vmul.f32 %v330_v35, %v517_v41  ;;  %v359_v41 = vmov 0.0  }
 0x157   :  { %v205_v60 = vmul.f32 %v332_v58, %v523_v44  ;;  %v233_v61 = vadd.f32 %v232_v59, %v231_v56  ;;  %14 = vst.msk [vmem:[#allocation2] sm:$0x1] %vm13_vm1, %v359_v41 }
 0x158   :  { %v234_v62 = vsel %vm31_vm0, %v203_v29, 0.0 }
 0x159   :  { %v334_v37 = vpop.eup %333  ;;  %v235_v63 = vadd.f32 %v234_v62, %v233_v61  ;;  %v236_v40 = vsel %vm31_vm0, %v205_v60, 0.0 }
 0x15a   :  { %v207_v1 = vmul.f32 %v334_v37, %v525_v45 }
 0x15b   :  { %v237_v2 = vadd.f32 %v236_v40, %v235_v63 }
 0x15c   :  { %v238_v4 = vsel %vm31_vm0, %v207_v1, 0.0 }
 0x15d   :  { %v239_v5 = vadd.f32 %v238_v4, %v237_v2 }
 0x15e   :  { %v208_v45 = vld [vmem:[#allocation2] sm:$0x1] }
 0x15f   :  { %240 = vadd.xlane.f32.xlu0 %v239_v5 }
 0x1ec   :  { %v241_v6 = vpop.xlane.xlu0 %240 }
 0x1ed   :  { %v242_v44 = vrot.slane %v241_v6, 4 }
 0x1ef   :  { %v243_v7 = vadd.f32 %v242_v44, %v241_v6 }
 0x1f1   :  { %v244_v54 = vrot.slane %v243_v7, 2 }
 0x1f3   :  { %v245_v8 = vadd.f32 %v244_v54, %v243_v7 }
 0x1f5   :  { %v246_v9 = vrot.slane %v245_v8, 1 }
 0x1f7   :  { %v247_v11 = vadd.f32 %v246_v9, %v245_v8 }
 0x1f9   :  { %267 = vpush %v247_v11 }
 0x22a   :  { %s268_s10 = spop %267 }
 0x22b   :  { %v249_v0 = vstv %s268_s10 }
 0x22c   :  { %v250_v12 = vadd.f32 %v249_v0, %v208_v45 }
 0x22e   :  { %252 = vst.msk [vmem:[#allocation2] sm:$0x1] %vm13_vm1, %v250_v12 }
 0x22f   :  { %346 = shalt.err (!%p343_p4)
}
 0x230   :  { %s347_s15 = scalar_lea.hbm %s578_s1, 16 }
 0x231   :  { %p348_p5 = scmp.ne.s32.totalorder %s578_s1, %s347_s15  ;;  %p351_p6 = scmp.lt.u32.totalorder %s347_s15, %s578_s1 }
 0x233   :  { %p353_p7 = pnand %p351_p6, %p348_p5 }
 0x235   :  { %356 = shalt.err (!%p353_p7)
}
 0x236   :  { %262 = dma.vmem_to_hbm [thread:$0]  %s260_s9, 16, %s578_s1, [#allocation3]  }
 0x237   :  { %357 = dma.done.wait [#allocation3], 16  }
 0x238   :  { %358 = vsyncadd [#allocation3], 4294967280 }
 0x239   :  { %266 = vsyncpa [#allocation3], 1 }

</bundles_post_ra>
